<compile_context>
chip_gen: v5e
topology: v5e:2x2
jax: 0.10.0
libtpu: 0.0.40
codegen_flags: <defaults>
</compile_context>

<pallas_src>
import functools

import numpy as np
import jax
import jax.numpy as jnp
from jax import lax
from jax.experimental import pallas as pl
from jax.experimental.pallas import tpu as pltpu


def _sirs_kernel(y0_ref, params_ref, out_ref, *, t_len):
    # Scalar loads from SMEM.
    S0 = y0_ref[0]
    I0 = y0_ref[1]
    R0 = y0_ref[2]
    iv = y0_ref[3]          # intervention start "i" (float)

    alpha0 = params_ref[0]
    beta = params_ref[1]
    gamma = params_ref[2]

    # ---- loop-invariant hoists ------------------------------------------------
    # Fold the "interventional" (i != 0) flag into the lower window bound: when
    # i == 0 the window is unreachable, so the loop needs only 2 compares + 1 AND.
    lo = jnp.where(iv != 0.0, iv + 4.0, jnp.float32(t_len + 1))   # j >= 5 + i - 1
    hi = iv + 9.0                                                 # j <= 10 + i - 1

    # Row 0 = initial condition (torch: y = y0.unsqueeze(0)); constant 4th column.
    out_ref[0, 0] = S0
    out_ref[0, 1] = I0
    out_ref[0, 2] = R0
    out_ref[0, 3] = iv

    # TODO(synk): the torch runtime `assert alpha >= 0 and beta >= 0 and gamma >= 0`
    #             is a host-side check with no in-kernel equivalent; documented as a
    #             wrapper precondition instead.
    def body(j, carry):
        S, I, R, jf = carry           # jf = float(j); avoids a per-iter int->f32 cast
        suppressed = jnp.logical_and(jf >= lo, jf <= hi)
        # mask is exactly 0 or 1 in the reference -> identical to a select on alpha.
        alpha = jnp.where(suppressed, jnp.float32(0.0), alpha0)

        gR = gamma * R
        bI = beta * I
        aSI = alpha * S * I
        # aSI-independent partial sums issue in parallel (2nd scalar slot) with the
        # alpha*S*I mul chain; final add/sub is the only op waiting on aSI.
        Sn = (S + gR) - aSI
        In = (I - bI) + aSI
        Rn = (R - gR) + bI

        out_ref[j, 0] = Sn
        out_ref[j, 1] = In
        out_ref[j, 2] = Rn
        out_ref[j, 3] = iv            # constant intervention column, fused in-kernel
        return (Sn, In, Rn, jf + 1.0)

    # Serial recurrence: full unroll only for short static t_len; cap otherwise.
    unroll = True if t_len <= 64 else 8
    lax.fori_loop(1, t_len, body, (S0, I0, R0, jnp.float32(1.0)), unroll=unroll)


@functools.partial(jax.jit, static_argnums=(2,))
def sirs_ode_naive_int(y0, params, t_len):
    """y0: (4,) f32, params: (3,) f32 (all params must be >= 0) -> (t_len, 4) f32."""
    if t_len < 1:
        raise ValueError("t_len must be >= 1 (row 0 is the initial condition)")
    y0 = y0.astype(jnp.float32)
    params = params.astype(jnp.float32)

    # Kernel emits the final (t_len, 4) trajectory directly -> no wrapper epilogue.
    return pl.pallas_call(
        functools.partial(_sirs_kernel, t_len=t_len),
        out_shape=jax.ShapeDtypeStruct((t_len, 4), jnp.float32),
        in_specs=[
            pl.BlockSpec(memory_space=pltpu.SMEM),   # y0 scalars
            pl.BlockSpec(memory_space=pltpu.SMEM),   # params scalars
        ],
        out_specs=pl.BlockSpec(memory_space=pltpu.SMEM),
        cost_estimate=pl.CostEstimate(
            flops=9 * t_len,              # ~3 muls + ~6 add/sub per Euler step
            transcendentals=0,
            bytes_accessed=16 * t_len + 28,
        ),
    )(y0, params)


def _reference(y0, params, t_len):
    """Plain NumPy re-implementation of the PyTorch forward for verification."""
    y0 = np.asarray(y0, np.float32)
    params = np.asarray(params, np.float32)
    i = y0[-1]
    interventional = np.float32(1.0 if i != 0.0 else 0.0)
    traj = [y0.copy()]
    S, I, R = y0[0], y0[1], y0[2]
    for j in range(1, t_len):
        in_window = (j >= 5 + i - 1) and (j <= 10 + i - 1)
        mask = interventional * (0.0 if in_window else 1.0) + (1.0 - interventional)
        alpha = params[0] * np.float32(mask)
        beta, gamma = params[1], params[2]
        dS = gamma * R - alpha * S * I
        dI = alpha * S * I - beta * I
        dR = beta * I - gamma * R
        S, I, R = S + dS, I + dI, R + dR
        traj.append(np.array([S, I, R, i], np.float32))
    return np.stack(traj, axis=0)


if __name__ == "__main__":
    T = 16  # len(self.t): number of trajectory rows

    key = jax.random.PRNGKey(0)
    k1, k2 = jax.random.split(key)

    # Deterministic small example: S+I+R population fractions, intervention at i=3.
    params = jax.random.uniform(k1, (3,), jnp.float32, minval=0.05, maxval=0.4)
    i0 = jnp.float32(3.0)
    I_init = jax.random.uniform(k2, (), jnp.float32, minval=0.01, maxval=0.05)
    y0 = jnp.array([1.0 - I_init, I_init, 0.0, i0], jnp.float32)

    out = sirs_ode_naive_int(y0, params, T)
    out = jax.block_until_ready(out)

    ref = _reference(np.array(y0), np.array(params), T)
    assert out.shape == (T, 4)
    assert np.allclose(np.array(out), ref, rtol=1e-5, atol=1e-6), (out, ref)

    # Also check the no-intervention path (i = 0).
    y0_noint = y0.at[3].set(0.0)
    out2 = jax.block_until_ready(sirs_ode_naive_int(y0_noint, params, T))
    ref2 = _reference(np.array(y0_noint), np.array(params), T)
    assert np.allclose(np.array(out2), ref2, rtol=1e-5, atol=1e-6), (out2, ref2)

    print("KERNEL_OK")
</pallas_src>

<mosaic_0001>
module attributes {stable_mosaic.version = 11 : i64} {
  func.func @_sirs_kernel(%arg0: memref<4xf32, #tpu.memory_space<smem>>, %arg1: memref<3xf32, #tpu.memory_space<smem>>, %arg2: memref<16x4xf32, #tpu.memory_space<smem>>) attributes {dimension_semantics = [], scalar_prefetch = 0 : i64, scratch_operands = 0 : i64, tpu.core_type = #tpu.core_type<tc>} {
    %c0 = arith.constant 0 : index
    %0 = memref.load %arg0[%c0] : memref<4xf32, #tpu.memory_space<smem>>
    %c1 = arith.constant 1 : index
    %1 = memref.load %arg0[%c1] : memref<4xf32, #tpu.memory_space<smem>>
    %c2 = arith.constant 2 : index
    %2 = memref.load %arg0[%c2] : memref<4xf32, #tpu.memory_space<smem>>
    %c3 = arith.constant 3 : index
    %3 = memref.load %arg0[%c3] : memref<4xf32, #tpu.memory_space<smem>>
    %c0_0 = arith.constant 0 : index
    %4 = memref.load %arg1[%c0_0] : memref<3xf32, #tpu.memory_space<smem>>
    %c1_1 = arith.constant 1 : index
    %5 = memref.load %arg1[%c1_1] : memref<3xf32, #tpu.memory_space<smem>>
    %c2_2 = arith.constant 2 : index
    %6 = memref.load %arg1[%c2_2] : memref<3xf32, #tpu.memory_space<smem>>
    %cst = arith.constant 0.000000e+00 : f32
    %7 = arith.cmpf one, %3, %cst : f32
    %cst_3 = arith.constant 4.000000e+00 : f32
    %8 = arith.addf %3, %cst_3 : f32
    %cst_4 = arith.constant 1.700000e+01 : f32
    %9 = arith.select %7, %8, %cst_4 : f32
    %cst_5 = arith.constant 9.000000e+00 : f32
    %10 = arith.addf %3, %cst_5 : f32
    %c0_6 = arith.constant 0 : index
    %c0_7 = arith.constant 0 : index
    %11 = memref.load %arg2[%c0_6, %c0_7] : memref<16x4xf32, #tpu.memory_space<smem>>
    memref.store %0, %arg2[%c0_6, %c0_7] : memref<16x4xf32, #tpu.memory_space<smem>>
    %c0_8 = arith.constant 0 : index
    %c1_9 = arith.constant 1 : index
    %12 = memref.load %arg2[%c0_8, %c1_9] : memref<16x4xf32, #tpu.memory_space<smem>>
    memref.store %1, %arg2[%c0_8, %c1_9] : memref<16x4xf32, #tpu.memory_space<smem>>
    %c0_10 = arith.constant 0 : index
    %c2_11 = arith.constant 2 : index
    %13 = memref.load %arg2[%c0_10, %c2_11] : memref<16x4xf32, #tpu.memory_space<smem>>
    memref.store %2, %arg2[%c0_10, %c2_11] : memref<16x4xf32, #tpu.memory_space<smem>>
    %c0_12 = arith.constant 0 : index
    %c3_13 = arith.constant 3 : index
    %14 = memref.load %arg2[%c0_12, %c3_13] : memref<16x4xf32, #tpu.memory_space<smem>>
    memref.store %3, %arg2[%c0_12, %c3_13] : memref<16x4xf32, #tpu.memory_space<smem>>
    %cst_14 = arith.constant 1.000000e+00 : f32
    %c1_i32 = arith.constant 1 : i32
    %15 = arith.cmpf oge, %cst_14, %9 : f32
    %16 = arith.cmpf ole, %cst_14, %10 : f32
    %17 = arith.andi %15, %16 : i1
    %cst_15 = arith.constant 0.000000e+00 : f32
    %18 = arith.select %17, %cst_15, %4 : f32
    %19 = arith.mulf %6, %2 : f32
    %20 = arith.mulf %5, %1 : f32
    %21 = arith.mulf %18, %0 : f32
    %22 = arith.mulf %21, %1 : f32
    %23 = arith.addf %0, %19 : f32
    %24 = arith.subf %23, %22 : f32
    %25 = arith.subf %1, %20 : f32
    %26 = arith.addf %25, %22 : f32
    %27 = arith.subf %2, %19 : f32
    %28 = arith.addf %27, %20 : f32
    %29 = arith.index_cast %c1_i32 : i32 to index
    %c0_16 = arith.constant 0 : index
    %30 = memref.load %arg2[%29, %c0_16] : memref<16x4xf32, #tpu.memory_space<smem>>
    memref.store %24, %arg2[%29, %c0_16] : memref<16x4xf32, #tpu.memory_space<smem>>
    %31 = arith.index_cast %c1_i32 : i32 to index
    %c1_17 = arith.constant 1 : index
    %32 = memref.load %arg2[%31, %c1_17] : memref<16x4xf32, #tpu.memory_space<smem>>
    memref.store %26, %arg2[%31, %c1_17] : memref<16x4xf32, #tpu.memory_space<smem>>
    %33 = arith.index_cast %c1_i32 : i32 to index
    %c2_18 = arith.constant 2 : index
    %34 = memref.load %arg2[%33, %c2_18] : memref<16x4xf32, #tpu.memory_space<smem>>
    memref.store %28, %arg2[%33, %c2_18] : memref<16x4xf32, #tpu.memory_space<smem>>
    %35 = arith.index_cast %c1_i32 : i32 to index
    %c3_19 = arith.constant 3 : index
    %36 = memref.load %arg2[%35, %c3_19] : memref<16x4xf32, #tpu.memory_space<smem>>
    memref.store %3, %arg2[%35, %c3_19] : memref<16x4xf32, #tpu.memory_space<smem>>
    %cst_20 = arith.constant 1.000000e+00 : f32
    %37 = arith.addf %cst_14, %cst_20 : f32
    %c2_i32 = arith.constant 2 : i32
    %38 = arith.cmpf oge, %37, %9 : f32
    %39 = arith.cmpf ole, %37, %10 : f32
    %40 = arith.andi %38, %39 : i1
    %cst_21 = arith.constant 0.000000e+00 : f32
    %41 = arith.select %40, %cst_21, %4 : f32
    %42 = arith.mulf %6, %28 : f32
    %43 = arith.mulf %5, %26 : f32
    %44 = arith.mulf %41, %24 : f32
    %45 = arith.mulf %44, %26 : f32
    %46 = arith.addf %24, %42 : f32
    %47 = arith.subf %46, %45 : f32
    %48 = arith.subf %26, %43 : f32
    %49 = arith.addf %48, %45 : f32
    %50 = arith.subf %28, %42 : f32
    %51 = arith.addf %50, %43 : f32
    %52 = arith.index_cast %c2_i32 : i32 to index
    %c0_22 = arith.constant 0 : index
    %53 = memref.load %arg2[%52, %c0_22] : memref<16x4xf32, #tpu.memory_space<smem>>
    memref.store %47, %arg2[%52, %c0_22] : memref<16x4xf32, #tpu.memory_space<smem>>
    %54 = arith.index_cast %c2_i32 : i32 to index
    %c1_23 = arith.constant 1 : index
    %55 = memref.load %arg2[%54, %c1_23] : memref<16x4xf32, #tpu.memory_space<smem>>
    memref.store %49, %arg2[%54, %c1_23] : memref<16x4xf32, #tpu.memory_space<smem>>
    %56 = arith.index_cast %c2_i32 : i32 to index
    %c2_24 = arith.constant 2 : index
    %57 = memref.load %arg2[%56, %c2_24] : memref<16x4xf32, #tpu.memory_space<smem>>
    memref.store %51, %arg2[%56, %c2_24] : memref<16x4xf32, #tpu.memory_space<smem>>
    %58 = arith.index_cast %c2_i32 : i32 to index
    %c3_25 = arith.constant 3 : index
    %59 = memref.load %arg2[%58, %c3_25] : memref<16x4xf32, #tpu.memory_space<smem>>
    memref.store %3, %arg2[%58, %c3_25] : memref<16x4xf32, #tpu.memory_space<smem>>
    %cst_26 = arith.constant 1.000000e+00 : f32
    %60 = arith.addf %37, %cst_26 : f32
    %c3_i32 = arith.constant 3 : i32
    %61 = arith.cmpf oge, %60, %9 : f32
    %62 = arith.cmpf ole, %60, %10 : f32
    %63 = arith.andi %61, %62 : i1
    %cst_27 = arith.constant 0.000000e+00 : f32
    %64 = arith.select %63, %cst_27, %4 : f32
    %65 = arith.mulf %6, %51 : f32
    %66 = arith.mulf %5, %49 : f32
    %67 = arith.mulf %64, %47 : f32
    %68 = arith.mulf %67, %49 : f32
    %69 = arith.addf %47, %65 : f32
    %70 = arith.subf %69, %68 : f32
    %71 = arith.subf %49, %66 : f32
    %72 = arith.addf %71, %68 : f32
    %73 = arith.subf %51, %65 : f32
    %74 = arith.addf %73, %66 : f32
    %75 = arith.index_cast %c3_i32 : i32 to index
    %c0_28 = arith.constant 0 : index
    %76 = memref.load %arg2[%75, %c0_28] : memref<16x4xf32, #tpu.memory_space<smem>>
    memref.store %70, %arg2[%75, %c0_28] : memref<16x4xf32, #tpu.memory_space<smem>>
    %77 = arith.index_cast %c3_i32 : i32 to index
    %c1_29 = arith.constant 1 : index
    %78 = memref.load %arg2[%77, %c1_29] : memref<16x4xf32, #tpu.memory_space<smem>>
    memref.store %72, %arg2[%77, %c1_29] : memref<16x4xf32, #tpu.memory_space<smem>>
    %79 = arith.index_cast %c3_i32 : i32 to index
    %c2_30 = arith.constant 2 : index
    %80 = memref.load %arg2[%79, %c2_30] : memref<16x4xf32, #tpu.memory_space<smem>>
    memref.store %74, %arg2[%79, %c2_30] : memref<16x4xf32, #tpu.memory_space<smem>>
    %81 = arith.index_cast %c3_i32 : i32 to index
    %c3_31 = arith.constant 3 : index
    %82 = memref.load %arg2[%81, %c3_31] : memref<16x4xf32, #tpu.memory_space<smem>>
    memref.store %3, %arg2[%81, %c3_31] : memref<16x4xf32, #tpu.memory_space<smem>>
    %cst_32 = arith.constant 1.000000e+00 : f32
    %83 = arith.addf %60, %cst_32 : f32
    %c4_i32 = arith.constant 4 : i32
    %84 = arith.cmpf oge, %83, %9 : f32
    %85 = arith.cmpf ole, %83, %10 : f32
    %86 = arith.andi %84, %85 : i1
    %cst_33 = arith.constant 0.000000e+00 : f32
    %87 = arith.select %86, %cst_33, %4 : f32
    %88 = arith.mulf %6, %74 : f32
    %89 = arith.mulf %5, %72 : f32
    %90 = arith.mulf %87, %70 : f32
    %91 = arith.mulf %90, %72 : f32
    %92 = arith.addf %70, %88 : f32
    %93 = arith.subf %92, %91 : f32
    %94 = arith.subf %72, %89 : f32
    %95 = arith.addf %94, %91 : f32
    %96 = arith.subf %74, %88 : f32
    %97 = arith.addf %96, %89 : f32
    %98 = arith.index_cast %c4_i32 : i32 to index
    %c0_34 = arith.constant 0 : index
    %99 = memref.load %arg2[%98, %c0_34] : memref<16x4xf32, #tpu.memory_space<smem>>
    memref.store %93, %arg2[%98, %c0_34] : memref<16x4xf32, #tpu.memory_space<smem>>
    %100 = arith.index_cast %c4_i32 : i32 to index
    %c1_35 = arith.constant 1 : index
    %101 = memref.load %arg2[%100, %c1_35] : memref<16x4xf32, #tpu.memory_space<smem>>
    memref.store %95, %arg2[%100, %c1_35] : memref<16x4xf32, #tpu.memory_space<smem>>
    %102 = arith.index_cast %c4_i32 : i32 to index
    %c2_36 = arith.constant 2 : index
    %103 = memref.load %arg2[%102, %c2_36] : memref<16x4xf32, #tpu.memory_space<smem>>
    memref.store %97, %arg2[%102, %c2_36] : memref<16x4xf32, #tpu.memory_space<smem>>
    %104 = arith.index_cast %c4_i32 : i32 to index
    %c3_37 = arith.constant 3 : index
    %105 = memref.load %arg2[%104, %c3_37] : memref<16x4xf32, #tpu.memory_space<smem>>
    memref.store %3, %arg2[%104, %c3_37] : memref<16x4xf32, #tpu.memory_space<smem>>
    %cst_38 = arith.constant 1.000000e+00 : f32
    %106 = arith.addf %83, %cst_38 : f32
    %c5_i32 = arith.constant 5 : i32
    %107 = arith.cmpf oge, %106, %9 : f32
    %108 = arith.cmpf ole, %106, %10 : f32
    %109 = arith.andi %107, %108 : i1
    %cst_39 = arith.constant 0.000000e+00 : f32
    %110 = arith.select %109, %cst_39, %4 : f32
    %111 = arith.mulf %6, %97 : f32
    %112 = arith.mulf %5, %95 : f32
    %113 = arith.mulf %110, %93 : f32
    %114 = arith.mulf %113, %95 : f32
    %115 = arith.addf %93, %111 : f32
    %116 = arith.subf %115, %114 : f32
    %117 = arith.subf %95, %112 : f32
    %118 = arith.addf %117, %114 : f32
    %119 = arith.subf %97, %111 : f32
    %120 = arith.addf %119, %112 : f32
    %121 = arith.index_cast %c5_i32 : i32 to index
    %c0_40 = arith.constant 0 : index
    %122 = memref.load %arg2[%121, %c0_40] : memref<16x4xf32, #tpu.memory_space<smem>>
    memref.store %116, %arg2[%121, %c0_40] : memref<16x4xf32, #tpu.memory_space<smem>>
    %123 = arith.index_cast %c5_i32 : i32 to index
    %c1_41 = arith.constant 1 : index
    %124 = memref.load %arg2[%123, %c1_41] : memref<16x4xf32, #tpu.memory_space<smem>>
    memref.store %118, %arg2[%123, %c1_41] : memref<16x4xf32, #tpu.memory_space<smem>>
    %125 = arith.index_cast %c5_i32 : i32 to index
    %c2_42 = arith.constant 2 : index
    %126 = memref.load %arg2[%125, %c2_42] : memref<16x4xf32, #tpu.memory_space<smem>>
    memref.store %120, %arg2[%125, %c2_42] : memref<16x4xf32, #tpu.memory_space<smem>>
    %127 = arith.index_cast %c5_i32 : i32 to index
    %c3_43 = arith.constant 3 : index
    %128 = memref.load %arg2[%127, %c3_43] : memref<16x4xf32, #tpu.memory_space<smem>>
    memref.store %3, %arg2[%127, %c3_43] : memref<16x4xf32, #tpu.memory_space<smem>>
    %cst_44 = arith.constant 1.000000e+00 : f32
    %129 = arith.addf %106, %cst_44 : f32
    %c6_i32 = arith.constant 6 : i32
    %130 = arith.cmpf oge, %129, %9 : f32
    %131 = arith.cmpf ole, %129, %10 : f32
    %132 = arith.andi %130, %131 : i1
    %cst_45 = arith.constant 0.000000e+00 : f32
    %133 = arith.select %132, %cst_45, %4 : f32
    %134 = arith.mulf %6, %120 : f32
    %135 = arith.mulf %5, %118 : f32
    %136 = arith.mulf %133, %116 : f32
    %137 = arith.mulf %136, %118 : f32
    %138 = arith.addf %116, %134 : f32
    %139 = arith.subf %138, %137 : f32
    %140 = arith.subf %118, %135 : f32
    %141 = arith.addf %140, %137 : f32
    %142 = arith.subf %120, %134 : f32
    %143 = arith.addf %142, %135 : f32
    %144 = arith.index_cast %c6_i32 : i32 to index
    %c0_46 = arith.constant 0 : index
    %145 = memref.load %arg2[%144, %c0_46] : memref<16x4xf32, #tpu.memory_space<smem>>
    memref.store %139, %arg2[%144, %c0_46] : memref<16x4xf32, #tpu.memory_space<smem>>
    %146 = arith.index_cast %c6_i32 : i32 to index
    %c1_47 = arith.constant 1 : index
    %147 = memref.load %arg2[%146, %c1_47] : memref<16x4xf32, #tpu.memory_space<smem>>
    memref.store %141, %arg2[%146, %c1_47] : memref<16x4xf32, #tpu.memory_space<smem>>
    %148 = arith.index_cast %c6_i32 : i32 to index
    %c2_48 = arith.constant 2 : index
    %149 = memref.load %arg2[%148, %c2_48] : memref<16x4xf32, #tpu.memory_space<smem>>
    memref.store %143, %arg2[%148, %c2_48] : memref<16x4xf32, #tpu.memory_space<smem>>
    %150 = arith.index_cast %c6_i32 : i32 to index
    %c3_49 = arith.constant 3 : index
    %151 = memref.load %arg2[%150, %c3_49] : memref<16x4xf32, #tpu.memory_space<smem>>
    memref.store %3, %arg2[%150, %c3_49] : memref<16x4xf32, #tpu.memory_space<smem>>
    %cst_50 = arith.constant 1.000000e+00 : f32
    %152 = arith.addf %129, %cst_50 : f32
    %c7_i32 = arith.constant 7 : i32
    %153 = arith.cmpf oge, %152, %9 : f32
    %154 = arith.cmpf ole, %152, %10 : f32
    %155 = arith.andi %153, %154 : i1
    %cst_51 = arith.constant 0.000000e+00 : f32
    %156 = arith.select %155, %cst_51, %4 : f32
    %157 = arith.mulf %6, %143 : f32
    %158 = arith.mulf %5, %141 : f32
    %159 = arith.mulf %156, %139 : f32
    %160 = arith.mulf %159, %141 : f32
    %161 = arith.addf %139, %157 : f32
    %162 = arith.subf %161, %160 : f32
    %163 = arith.subf %141, %158 : f32
    %164 = arith.addf %163, %160 : f32
    %165 = arith.subf %143, %157 : f32
    %166 = arith.addf %165, %158 : f32
    %167 = arith.index_cast %c7_i32 : i32 to index
    %c0_52 = arith.constant 0 : index
    %168 = memref.load %arg2[%167, %c0_52] : memref<16x4xf32, #tpu.memory_space<smem>>
    memref.store %162, %arg2[%167, %c0_52] : memref<16x4xf32, #tpu.memory_space<smem>>
    %169 = arith.index_cast %c7_i32 : i32 to index
    %c1_53 = arith.constant 1 : index
    %170 = memref.load %arg2[%169, %c1_53] : memref<16x4xf32, #tpu.memory_space<smem>>
    memref.store %164, %arg2[%169, %c1_53] : memref<16x4xf32, #tpu.memory_space<smem>>
    %171 = arith.index_cast %c7_i32 : i32 to index
    %c2_54 = arith.constant 2 : index
    %172 = memref.load %arg2[%171, %c2_54] : memref<16x4xf32, #tpu.memory_space<smem>>
    memref.store %166, %arg2[%171, %c2_54] : memref<16x4xf32, #tpu.memory_space<smem>>
    %173 = arith.index_cast %c7_i32 : i32 to index
    %c3_55 = arith.constant 3 : index
    %174 = memref.load %arg2[%173, %c3_55] : memref<16x4xf32, #tpu.memory_space<smem>>
    memref.store %3, %arg2[%173, %c3_55] : memref<16x4xf32, #tpu.memory_space<smem>>
    %cst_56 = arith.constant 1.000000e+00 : f32
    %175 = arith.addf %152, %cst_56 : f32
    %c8_i32 = arith.constant 8 : i32
    %176 = arith.cmpf oge, %175, %9 : f32
    %177 = arith.cmpf ole, %175, %10 : f32
    %178 = arith.andi %176, %177 : i1
    %cst_57 = arith.constant 0.000000e+00 : f32
    %179 = arith.select %178, %cst_57, %4 : f32
    %180 = arith.mulf %6, %166 : f32
    %181 = arith.mulf %5, %164 : f32
    %182 = arith.mulf %179, %162 : f32
    %183 = arith.mulf %182, %164 : f32
    %184 = arith.addf %162, %180 : f32
    %185 = arith.subf %184, %183 : f32
    %186 = arith.subf %164, %181 : f32
    %187 = arith.addf %186, %183 : f32
    %188 = arith.subf %166, %180 : f32
    %189 = arith.addf %188, %181 : f32
    %190 = arith.index_cast %c8_i32 : i32 to index
    %c0_58 = arith.constant 0 : index
    %191 = memref.load %arg2[%190, %c0_58] : memref<16x4xf32, #tpu.memory_space<smem>>
    memref.store %185, %arg2[%190, %c0_58] : memref<16x4xf32, #tpu.memory_space<smem>>
    %192 = arith.index_cast %c8_i32 : i32 to index
    %c1_59 = arith.constant 1 : index
    %193 = memref.load %arg2[%192, %c1_59] : memref<16x4xf32, #tpu.memory_space<smem>>
    memref.store %187, %arg2[%192, %c1_59] : memref<16x4xf32, #tpu.memory_space<smem>>
    %194 = arith.index_cast %c8_i32 : i32 to index
    %c2_60 = arith.constant 2 : index
    %195 = memref.load %arg2[%194, %c2_60] : memref<16x4xf32, #tpu.memory_space<smem>>
    memref.store %189, %arg2[%194, %c2_60] : memref<16x4xf32, #tpu.memory_space<smem>>
    %196 = arith.index_cast %c8_i32 : i32 to index
    %c3_61 = arith.constant 3 : index
    %197 = memref.load %arg2[%196, %c3_61] : memref<16x4xf32, #tpu.memory_space<smem>>
    memref.store %3, %arg2[%196, %c3_61] : memref<16x4xf32, #tpu.memory_space<smem>>
    %cst_62 = arith.constant 1.000000e+00 : f32
    %198 = arith.addf %175, %cst_62 : f32
    %c9_i32 = arith.constant 9 : i32
    %199 = arith.cmpf oge, %198, %9 : f32
    %200 = arith.cmpf ole, %198, %10 : f32
    %201 = arith.andi %199, %200 : i1
    %cst_63 = arith.constant 0.000000e+00 : f32
    %202 = arith.select %201, %cst_63, %4 : f32
    %203 = arith.mulf %6, %189 : f32
    %204 = arith.mulf %5, %187 : f32
    %205 = arith.mulf %202, %185 : f32
    %206 = arith.mulf %205, %187 : f32
    %207 = arith.addf %185, %203 : f32
    %208 = arith.subf %207, %206 : f32
    %209 = arith.subf %187, %204 : f32
    %210 = arith.addf %209, %206 : f32
    %211 = arith.subf %189, %203 : f32
    %212 = arith.addf %211, %204 : f32
    %213 = arith.index_cast %c9_i32 : i32 to index
    %c0_64 = arith.constant 0 : index
    %214 = memref.load %arg2[%213, %c0_64] : memref<16x4xf32, #tpu.memory_space<smem>>
    memref.store %208, %arg2[%213, %c0_64] : memref<16x4xf32, #tpu.memory_space<smem>>
    %215 = arith.index_cast %c9_i32 : i32 to index
    %c1_65 = arith.constant 1 : index
    %216 = memref.load %arg2[%215, %c1_65] : memref<16x4xf32, #tpu.memory_space<smem>>
    memref.store %210, %arg2[%215, %c1_65] : memref<16x4xf32, #tpu.memory_space<smem>>
    %217 = arith.index_cast %c9_i32 : i32 to index
    %c2_66 = arith.constant 2 : index
    %218 = memref.load %arg2[%217, %c2_66] : memref<16x4xf32, #tpu.memory_space<smem>>
    memref.store %212, %arg2[%217, %c2_66] : memref<16x4xf32, #tpu.memory_space<smem>>
    %219 = arith.index_cast %c9_i32 : i32 to index
    %c3_67 = arith.constant 3 : index
    %220 = memref.load %arg2[%219, %c3_67] : memref<16x4xf32, #tpu.memory_space<smem>>
    memref.store %3, %arg2[%219, %c3_67] : memref<16x4xf32, #tpu.memory_space<smem>>
    %cst_68 = arith.constant 1.000000e+00 : f32
    %221 = arith.addf %198, %cst_68 : f32
    %c10_i32 = arith.constant 10 : i32
    %222 = arith.cmpf oge, %221, %9 : f32
    %223 = arith.cmpf ole, %221, %10 : f32
    %224 = arith.andi %222, %223 : i1
    %cst_69 = arith.constant 0.000000e+00 : f32
    %225 = arith.select %224, %cst_69, %4 : f32
    %226 = arith.mulf %6, %212 : f32
    %227 = arith.mulf %5, %210 : f32
    %228 = arith.mulf %225, %208 : f32
    %229 = arith.mulf %228, %210 : f32
    %230 = arith.addf %208, %226 : f32
    %231 = arith.subf %230, %229 : f32
    %232 = arith.subf %210, %227 : f32
    %233 = arith.addf %232, %229 : f32
    %234 = arith.subf %212, %226 : f32
    %235 = arith.addf %234, %227 : f32
    %236 = arith.index_cast %c10_i32 : i32 to index
    %c0_70 = arith.constant 0 : index
    %237 = memref.load %arg2[%236, %c0_70] : memref<16x4xf32, #tpu.memory_space<smem>>
    memref.store %231, %arg2[%236, %c0_70] : memref<16x4xf32, #tpu.memory_space<smem>>
    %238 = arith.index_cast %c10_i32 : i32 to index
    %c1_71 = arith.constant 1 : index
    %239 = memref.load %arg2[%238, %c1_71] : memref<16x4xf32, #tpu.memory_space<smem>>
    memref.store %233, %arg2[%238, %c1_71] : memref<16x4xf32, #tpu.memory_space<smem>>
    %240 = arith.index_cast %c10_i32 : i32 to index
    %c2_72 = arith.constant 2 : index
    %241 = memref.load %arg2[%240, %c2_72] : memref<16x4xf32, #tpu.memory_space<smem>>
    memref.store %235, %arg2[%240, %c2_72] : memref<16x4xf32, #tpu.memory_space<smem>>
    %242 = arith.index_cast %c10_i32 : i32 to index
    %c3_73 = arith.constant 3 : index
    %243 = memref.load %arg2[%242, %c3_73] : memref<16x4xf32, #tpu.memory_space<smem>>
    memref.store %3, %arg2[%242, %c3_73] : memref<16x4xf32, #tpu.memory_space<smem>>
    %cst_74 = arith.constant 1.000000e+00 : f32
    %244 = arith.addf %221, %cst_74 : f32
    %c11_i32 = arith.constant 11 : i32
    %245 = arith.cmpf oge, %244, %9 : f32
    %246 = arith.cmpf ole, %244, %10 : f32
    %247 = arith.andi %245, %246 : i1
    %cst_75 = arith.constant 0.000000e+00 : f32
    %248 = arith.select %247, %cst_75, %4 : f32
    %249 = arith.mulf %6, %235 : f32
    %250 = arith.mulf %5, %233 : f32
    %251 = arith.mulf %248, %231 : f32
    %252 = arith.mulf %251, %233 : f32
    %253 = arith.addf %231, %249 : f32
    %254 = arith.subf %253, %252 : f32
    %255 = arith.subf %233, %250 : f32
    %256 = arith.addf %255, %252 : f32
    %257 = arith.subf %235, %249 : f32
    %258 = arith.addf %257, %250 : f32
    %259 = arith.index_cast %c11_i32 : i32 to index
    %c0_76 = arith.constant 0 : index
    %260 = memref.load %arg2[%259, %c0_76] : memref<16x4xf32, #tpu.memory_space<smem>>
    memref.store %254, %arg2[%259, %c0_76] : memref<16x4xf32, #tpu.memory_space<smem>>
    %261 = arith.index_cast %c11_i32 : i32 to index
    %c1_77 = arith.constant 1 : index
    %262 = memref.load %arg2[%261, %c1_77] : memref<16x4xf32, #tpu.memory_space<smem>>
    memref.store %256, %arg2[%261, %c1_77] : memref<16x4xf32, #tpu.memory_space<smem>>
    %263 = arith.index_cast %c11_i32 : i32 to index
    %c2_78 = arith.constant 2 : index
    %264 = memref.load %arg2[%263, %c2_78] : memref<16x4xf32, #tpu.memory_space<smem>>
    memref.store %258, %arg2[%263, %c2_78] : memref<16x4xf32, #tpu.memory_space<smem>>
    %265 = arith.index_cast %c11_i32 : i32 to index
    %c3_79 = arith.constant 3 : index
    %266 = memref.load %arg2[%265, %c3_79] : memref<16x4xf32, #tpu.memory_space<smem>>
    memref.store %3, %arg2[%265, %c3_79] : memref<16x4xf32, #tpu.memory_space<smem>>
    %cst_80 = arith.constant 1.000000e+00 : f32
    %267 = arith.addf %244, %cst_80 : f32
    %c12_i32 = arith.constant 12 : i32
    %268 = arith.cmpf oge, %267, %9 : f32
    %269 = arith.cmpf ole, %267, %10 : f32
    %270 = arith.andi %268, %269 : i1
    %cst_81 = arith.constant 0.000000e+00 : f32
    %271 = arith.select %270, %cst_81, %4 : f32
    %272 = arith.mulf %6, %258 : f32
    %273 = arith.mulf %5, %256 : f32
    %274 = arith.mulf %271, %254 : f32
    %275 = arith.mulf %274, %256 : f32
    %276 = arith.addf %254, %272 : f32
    %277 = arith.subf %276, %275 : f32
    %278 = arith.subf %256, %273 : f32
    %279 = arith.addf %278, %275 : f32
    %280 = arith.subf %258, %272 : f32
    %281 = arith.addf %280, %273 : f32
    %282 = arith.index_cast %c12_i32 : i32 to index
    %c0_82 = arith.constant 0 : index
    %283 = memref.load %arg2[%282, %c0_82] : memref<16x4xf32, #tpu.memory_space<smem>>
    memref.store %277, %arg2[%282, %c0_82] : memref<16x4xf32, #tpu.memory_space<smem>>
    %284 = arith.index_cast %c12_i32 : i32 to index
    %c1_83 = arith.constant 1 : index
    %285 = memref.load %arg2[%284, %c1_83] : memref<16x4xf32, #tpu.memory_space<smem>>
    memref.store %279, %arg2[%284, %c1_83] : memref<16x4xf32, #tpu.memory_space<smem>>
    %286 = arith.index_cast %c12_i32 : i32 to index
    %c2_84 = arith.constant 2 : index
    %287 = memref.load %arg2[%286, %c2_84] : memref<16x4xf32, #tpu.memory_space<smem>>
    memref.store %281, %arg2[%286, %c2_84] : memref<16x4xf32, #tpu.memory_space<smem>>
    %288 = arith.index_cast %c12_i32 : i32 to index
    %c3_85 = arith.constant 3 : index
    %289 = memref.load %arg2[%288, %c3_85] : memref<16x4xf32, #tpu.memory_space<smem>>
    memref.store %3, %arg2[%288, %c3_85] : memref<16x4xf32, #tpu.memory_space<smem>>
    %cst_86 = arith.constant 1.000000e+00 : f32
    %290 = arith.addf %267, %cst_86 : f32
    %c13_i32 = arith.constant 13 : i32
    %291 = arith.cmpf oge, %290, %9 : f32
    %292 = arith.cmpf ole, %290, %10 : f32
    %293 = arith.andi %291, %292 : i1
    %cst_87 = arith.constant 0.000000e+00 : f32
    %294 = arith.select %293, %cst_87, %4 : f32
    %295 = arith.mulf %6, %281 : f32
    %296 = arith.mulf %5, %279 : f32
    %297 = arith.mulf %294, %277 : f32
    %298 = arith.mulf %297, %279 : f32
    %299 = arith.addf %277, %295 : f32
    %300 = arith.subf %299, %298 : f32
    %301 = arith.subf %279, %296 : f32
    %302 = arith.addf %301, %298 : f32
    %303 = arith.subf %281, %295 : f32
    %304 = arith.addf %303, %296 : f32
    %305 = arith.index_cast %c13_i32 : i32 to index
    %c0_88 = arith.constant 0 : index
    %306 = memref.load %arg2[%305, %c0_88] : memref<16x4xf32, #tpu.memory_space<smem>>
    memref.store %300, %arg2[%305, %c0_88] : memref<16x4xf32, #tpu.memory_space<smem>>
    %307 = arith.index_cast %c13_i32 : i32 to index
    %c1_89 = arith.constant 1 : index
    %308 = memref.load %arg2[%307, %c1_89] : memref<16x4xf32, #tpu.memory_space<smem>>
    memref.store %302, %arg2[%307, %c1_89] : memref<16x4xf32, #tpu.memory_space<smem>>
    %309 = arith.index_cast %c13_i32 : i32 to index
    %c2_90 = arith.constant 2 : index
    %310 = memref.load %arg2[%309, %c2_90] : memref<16x4xf32, #tpu.memory_space<smem>>
    memref.store %304, %arg2[%309, %c2_90] : memref<16x4xf32, #tpu.memory_space<smem>>
    %311 = arith.index_cast %c13_i32 : i32 to index
    %c3_91 = arith.constant 3 : index
    %312 = memref.load %arg2[%311, %c3_91] : memref<16x4xf32, #tpu.memory_space<smem>>
    memref.store %3, %arg2[%311, %c3_91] : memref<16x4xf32, #tpu.memory_space<smem>>
    %cst_92 = arith.constant 1.000000e+00 : f32
    %313 = arith.addf %290, %cst_92 : f32
    %c14_i32 = arith.constant 14 : i32
    %314 = arith.cmpf oge, %313, %9 : f32
    %315 = arith.cmpf ole, %313, %10 : f32
    %316 = arith.andi %314, %315 : i1
    %cst_93 = arith.constant 0.000000e+00 : f32
    %317 = arith.select %316, %cst_93, %4 : f32
    %318 = arith.mulf %6, %304 : f32
    %319 = arith.mulf %5, %302 : f32
    %320 = arith.mulf %317, %300 : f32
    %321 = arith.mulf %320, %302 : f32
    %322 = arith.addf %300, %318 : f32
    %323 = arith.subf %322, %321 : f32
    %324 = arith.subf %302, %319 : f32
    %325 = arith.addf %324, %321 : f32
    %326 = arith.subf %304, %318 : f32
    %327 = arith.addf %326, %319 : f32
    %328 = arith.index_cast %c14_i32 : i32 to index
    %c0_94 = arith.constant 0 : index
    %329 = memref.load %arg2[%328, %c0_94] : memref<16x4xf32, #tpu.memory_space<smem>>
    memref.store %323, %arg2[%328, %c0_94] : memref<16x4xf32, #tpu.memory_space<smem>>
    %330 = arith.index_cast %c14_i32 : i32 to index
    %c1_95 = arith.constant 1 : index
    %331 = memref.load %arg2[%330, %c1_95] : memref<16x4xf32, #tpu.memory_space<smem>>
    memref.store %325, %arg2[%330, %c1_95] : memref<16x4xf32, #tpu.memory_space<smem>>
    %332 = arith.index_cast %c14_i32 : i32 to index
    %c2_96 = arith.constant 2 : index
    %333 = memref.load %arg2[%332, %c2_96] : memref<16x4xf32, #tpu.memory_space<smem>>
    memref.store %327, %arg2[%332, %c2_96] : memref<16x4xf32, #tpu.memory_space<smem>>
    %334 = arith.index_cast %c14_i32 : i32 to index
    %c3_97 = arith.constant 3 : index
    %335 = memref.load %arg2[%334, %c3_97] : memref<16x4xf32, #tpu.memory_space<smem>>
    memref.store %3, %arg2[%334, %c3_97] : memref<16x4xf32, #tpu.memory_space<smem>>
    %cst_98 = arith.constant 1.000000e+00 : f32
    %336 = arith.addf %313, %cst_98 : f32
    %c15_i32 = arith.constant 15 : i32
    %337 = arith.cmpf oge, %336, %9 : f32
    %338 = arith.cmpf ole, %336, %10 : f32
    %339 = arith.andi %337, %338 : i1
    %cst_99 = arith.constant 0.000000e+00 : f32
    %340 = arith.select %339, %cst_99, %4 : f32
    %341 = arith.mulf %6, %327 : f32
    %342 = arith.mulf %5, %325 : f32
    %343 = arith.mulf %340, %323 : f32
    %344 = arith.mulf %343, %325 : f32
    %345 = arith.addf %323, %341 : f32
    %346 = arith.subf %345, %344 : f32
    %347 = arith.subf %325, %342 : f32
    %348 = arith.addf %347, %344 : f32
    %349 = arith.subf %327, %341 : f32
    %350 = arith.addf %349, %342 : f32
    %351 = arith.index_cast %c15_i32 : i32 to index
    %c0_100 = arith.constant 0 : index
    %352 = memref.load %arg2[%351, %c0_100] : memref<16x4xf32, #tpu.memory_space<smem>>
    memref.store %346, %arg2[%351, %c0_100] : memref<16x4xf32, #tpu.memory_space<smem>>
    %353 = arith.index_cast %c15_i32 : i32 to index
    %c1_101 = arith.constant 1 : index
    %354 = memref.load %arg2[%353, %c1_101] : memref<16x4xf32, #tpu.memory_space<smem>>
    memref.store %348, %arg2[%353, %c1_101] : memref<16x4xf32, #tpu.memory_space<smem>>
    %355 = arith.index_cast %c15_i32 : i32 to index
    %c2_102 = arith.constant 2 : index
    %356 = memref.load %arg2[%355, %c2_102] : memref<16x4xf32, #tpu.memory_space<smem>>
    memref.store %350, %arg2[%355, %c2_102] : memref<16x4xf32, #tpu.memory_space<smem>>
    %357 = arith.index_cast %c15_i32 : i32 to index
    %c3_103 = arith.constant 3 : index
    %358 = memref.load %arg2[%357, %c3_103] : memref<16x4xf32, #tpu.memory_space<smem>>
    memref.store %3, %arg2[%357, %c3_103] : memref<16x4xf32, #tpu.memory_space<smem>>
    %cst_104 = arith.constant 1.000000e+00 : f32
    %359 = arith.addf %336, %cst_104 : f32
    %c15_i32_105 = arith.constant 15 : i32
    return
  }
}

</mosaic_0001>

<bundles_post_ra>
// kernel: sirs_ode_naive_int.1
= control target key start
LH: loop header
LB: loop body
LE: loop exit
PB: predicated region body
PF: predicated region fallthrough
CT: control target
= control target key end

     0   :  { %7 = vsyncpa [#allocation3], 0  ;;  %s668_s0 = inlined_call_operand.hbm [shape: f32[4], index: 0, kind: input, shape index: {}]   ;;  %s669_s1 = inlined_call_operand.hbm [shape: f32[3], index: 1, kind: input, shape index: {}]   ;;  %s670_s2 = inlined_call_operand.vmem [shape: f32[16,4], index: 2, kind: output, shape index: {}]  }
   0x1   :  { %8 = vsyncpa [#allocation6], 0 }
   0x2   :  { %9 = vsyncpa [#allocation4], 0  ;;  %s15_s11 = sshll.u32 %s668_s0, 4  ;;  %s24_s14 = sshll.u32 %s669_s1, 4  ;;  %s16_s11 = int_to_ptr.hbm [resolvable:$true] %s15_s11  ;;  %s25_s14 = int_to_ptr.hbm [resolvable:$true] %s24_s14 }
   0x3   :  { %s517_s15 = smov [#allocation2]   ;;  %s518_s16 = smov [#allocation5]  }
   0x4   :  { %18 = dma.hbm_to_smem %s16_s11, 16, %s517_s15, [#allocation3]  }
   0x5   :  { %27 = dma.hbm_to_smem %s25_s14, 16, %s518_s16, [#allocation6]  }
   0x6   :  { %511 = dma.done.wait [#allocation3], 16  }
   0x7   :  { %512 = vsyncadd [#allocation3], 4294967280 }
   0x8   :  { %513 = dma.done.wait [#allocation6], 16  }
   0x9   :  { %514 = vsyncadd [#allocation6], 4294967280 }
   0xa   :  { %36 = sfence }
   0xb   :  { %s543_s17 = sld [smem:[#allocation2]] }
   0xc   :  { %s545_s18 = sld [smem:[#allocation2 + $0x1]] }
   0xd   :  { %s547_s0 = sld [smem:[#allocation2 + $0x2]] }
   0xe   :  { %s549_s1 = sld [smem:[#allocation2 + $0x3]] }
   0xf   :  { %s551_s19 = sld [smem:[#allocation5]] }
  0x10   :  { %s553_s20 = sld [smem:[#allocation5 + $0x1]] }
  0x11   :  { %s555_s21 = sld [smem:[#allocation5 + $0x2]] }
  0x12   :  { %49 = sst [smem:[#allocation7]] %s543_s17 }
  0x13   :  { %51 = sst [smem:[#allocation7 + $0x1]] %s545_s18 }
  0x14   :  { %p44_p0 = scmp.ne.f32.partialorder %s549_s1, 0.0  ;;  %s45_s22 = sadd.f32 4.0, %s549_s1 }
  0x15   :  { %s562_s23 = sadd.f32 9.0, %s549_s1 }
  0x16   :  { %s672_s22 = smov (!%p44_p0, %s45_s22), 17.0  ;;  %53 = sst [smem:[#allocation7 + $0x2]] %s547_s0 }
  0x17   :  { %p426_p1 = scmp.ge.f32.partialorder %s562_s23, 1.0  ;;  %55 = sst [smem:[#allocation7 + $0x3]] %s549_s1 }
  0x18   :  { %p425_p2 = scmp.le.f32.partialorder %s672_s22, 1.0  ;;  %s61_s24 = smul.f32 %s555_s21, %s547_s0 }
  0x19   :  { %78 = sst [smem:[#allocation7 + $0x83]] %s549_s1  ;;  %s62_s25 = smul.f32 %s553_s20, %s545_s18 }
  0x1a   :  { %p58_p3 = pnand %p426_p1, %p425_p2  ;;  %s65_s26 = sadd.f32 %s61_s24, %s543_s17 }
  0x1b   :  { %p428_p4 = scmp.le.f32.partialorder %s672_s22, 2.0  ;;  %s67_s28 = ssub.f32 %s545_s18, %s62_s25 }
  0x1c   :  { %s427_s27 = scalar_select %p58_p3, %s551_s19, 0.0 }
  0x1d   :  { %p429_p5 = scmp.ge.f32.partialorder %s562_s23, 2.0  ;;  %s69_s30 = ssub.f32 %s547_s0, %s61_s24 }
  0x1e   :  { %s63_s29 = smul.f32 %s427_s27, %s543_s17  ;;  %101 = sst [smem:[#allocation7 + $0x103]] %s549_s1 }
  0x1f   :  { %p81_p6 = pnand %p429_p5, %p428_p4  ;;  %s70_s4 = sadd.f32 %s69_s30, %s62_s25 }
  0x20   :  { %s64_s3 = smul.f32 %s545_s18, %s63_s29  ;;  %p431_p7 = scmp.le.f32.partialorder %s672_s22, 3.0 }
  0x21   :  { %s430_s5 = scalar_select %p81_p6, %s551_s19, 0.0 }
  0x22   :  { %s66_s6 = ssub.f32 %s65_s26, %s64_s3  ;;  %s84_s8 = smul.f32 %s555_s21, %s70_s4 }
  0x23   :  { %s68_s7 = sadd.f32 %s67_s28, %s64_s3  ;;  %p432_p8 = scmp.ge.f32.partialorder %s562_s23, 3.0 }
  0x24   :  { %72 = sst [smem:[#allocation7 + $0x80]] %s66_s6  ;;  %s86_s9 = smul.f32 %s430_s5, %s66_s6 }
  0x25   :  { %74 = sst [smem:[#allocation7 + $0x81]] %s68_s7  ;;  %s85_s10 = smul.f32 %s553_s20, %s68_s7 }
  0x26   :  { %76 = sst [smem:[#allocation7 + $0x82]] %s70_s4  ;;  %s87_s11 = smul.f32 %s86_s9, %s68_s7 }
  0x27   :  { %s88_s12 = sadd.f32 %s84_s8, %s66_s6  ;;  %p104_p9 = pnand %p432_p8, %p431_p7 }
  0x28   :  { %s90_s13 = ssub.f32 %s68_s7, %s85_s10  ;;  %p434_p10 = scmp.le.f32.partialorder %s672_s22, 4.0 }
  0x29   :  { %s89_s14 = ssub.f32 %s88_s12, %s87_s11  ;;  %p435_p11 = scmp.ge.f32.partialorder %s562_s23, 4.0 }
  0x2a   :  { %s91_s15 = sadd.f32 %s90_s13, %s87_s11  ;;  %p437_p13 = scmp.le.f32.partialorder %s672_s22, 5.0 }
  0x2b   :  { %s92_s16 = ssub.f32 %s70_s4, %s84_s8  ;;  %p127_p12 = pnand %p435_p11, %p434_p10 }
  0x2c   :  { %95 = sst [smem:[#allocation7 + $0x100]] %s89_s14  ;;  %s108_s18 = smul.f32 %s553_s20, %s91_s15 }
  0x2d   :  { %s93_s17 = sadd.f32 %s92_s16, %s85_s10  ;;  %p438_p0 = scmp.ge.f32.partialorder %s562_s23, 5.0 }
  0x2e   :  { %97 = sst [smem:[#allocation7 + $0x101]] %s91_s15  ;;  %p440_p2 = scmp.le.f32.partialorder %s672_s22, 6.0 }
  0x2f   :  { %99 = sst [smem:[#allocation7 + $0x102]] %s93_s17  ;;  %s107_s0 = smul.f32 %s555_s21, %s93_s17 }
  0x30   :  { %s433_s24 = scalar_select %p104_p9, %s551_s19, 0.0 }
  0x31   :  { %s111_s25 = sadd.f32 %s107_s0, %s89_s14  ;;  %p150_p1 = pnand %p438_p0, %p437_p13 }
  0x32   :  { %s109_s26 = smul.f32 %s433_s24, %s89_s14  ;;  %s113_s27 = ssub.f32 %s91_s15, %s108_s18 }
  0x33   :  { %s115_s28 = ssub.f32 %s93_s17, %s107_s0  ;;  %p441_p3 = scmp.ge.f32.partialorder %s562_s23, 6.0 }
  0x34   :  { %s110_s29 = smul.f32 %s109_s26, %s91_s15  ;;  %124 = sst [smem:[#allocation7 + $0x183]] %s549_s1 }
  0x35   :  { %s116_s30 = sadd.f32 %s115_s28, %s108_s18  ;;  %p173_p4 = pnand %p441_p3, %p440_p2 }
  0x36   :  { %s112_s3 = ssub.f32 %s111_s25, %s110_s29  ;;  %p443_p5 = scmp.le.f32.partialorder %s672_s22, 7.0 }
  0x37   :  { %s114_s4 = sadd.f32 %s113_s27, %s110_s29  ;;  %s130_s5 = smul.f32 %s555_s21, %s116_s30 }
  0x38   :  { %118 = sst [smem:[#allocation7 + $0x180]] %s112_s3  ;;  %p444_p6 = scmp.ge.f32.partialorder %s562_s23, 7.0 }
  0x39   :  { %120 = sst [smem:[#allocation7 + $0x181]] %s114_s4  ;;  %s131_s6 = smul.f32 %s553_s20, %s114_s4 }
  0x3a   :  { %122 = sst [smem:[#allocation7 + $0x182]] %s116_s30  ;;  %p196_p7 = pnand %p444_p6, %p443_p5 }
  0x3b   :  { %s436_s7 = scalar_select %p127_p12, %s551_s19, 0.0 }
  0x3c   :  { %s134_s8 = sadd.f32 %s130_s5, %s112_s3  ;;  %p446_p8 = scmp.le.f32.partialorder %s672_s22, 8.0 }
  0x3d   :  { %s132_s9 = smul.f32 %s436_s7, %s112_s3  ;;  %s136_s10 = ssub.f32 %s114_s4, %s131_s6 }
  0x3e   :  { %s138_s11 = ssub.f32 %s116_s30, %s130_s5  ;;  %p447_p9 = scmp.ge.f32.partialorder %s562_s23, 8.0 }
  0x3f   :  { %s133_s12 = smul.f32 %s132_s9, %s114_s4  ;;  %147 = sst [smem:[#allocation7 + $0x203]] %s549_s1 }
  0x40   :  { %s139_s13 = sadd.f32 %s138_s11, %s131_s6  ;;  %p219_p10 = pnand %p447_p9, %p446_p8 }
  0x41   :  { %s135_s14 = ssub.f32 %s134_s8, %s133_s12  ;;  %p449_p11 = scmp.le.f32.partialorder %s672_s22, 9.0 }
  0x42   :  { %s137_s15 = sadd.f32 %s136_s10, %s133_s12  ;;  %s153_s16 = smul.f32 %s555_s21, %s139_s13 }
  0x43   :  { %141 = sst [smem:[#allocation7 + $0x200]] %s135_s14  ;;  %p450_p12 = scmp.ge.f32.partialorder %s562_s23, 9.0 }
  0x44   :  { %143 = sst [smem:[#allocation7 + $0x201]] %s137_s15  ;;  %s154_s17 = smul.f32 %s553_s20, %s137_s15 }
  0x45   :  { %145 = sst [smem:[#allocation7 + $0x202]] %s139_s13  ;;  %p242_p13 = pnand %p450_p12, %p449_p11 }
  0x46   :  { %s439_s18 = scalar_select %p150_p1, %s551_s19, 0.0 }
  0x47   :  { %s157_s0 = sadd.f32 %s153_s16, %s135_s14  ;;  %p452_p0 = scmp.le.f32.partialorder %s672_s22, 10.0 }
  0x48   :  { %s155_s24 = smul.f32 %s439_s18, %s135_s14  ;;  %s159_s25 = ssub.f32 %s137_s15, %s154_s17 }
  0x49   :  { %s161_s26 = ssub.f32 %s139_s13, %s153_s16  ;;  %p453_p1 = scmp.ge.f32.partialorder %s562_s23, 10.0 }
  0x4a   :  { %s156_s27 = smul.f32 %s155_s24, %s137_s15  ;;  %170 = sst [smem:[#allocation7 + $0x283]] %s549_s1 }
  0x4b   :  { %s162_s28 = sadd.f32 %s161_s26, %s154_s17  ;;  %p265_p2 = pnand %p453_p1, %p452_p0 }
  0x4c   :  { %s158_s29 = ssub.f32 %s157_s0, %s156_s27  ;;  %p455_p3 = scmp.le.f32.partialorder %s672_s22, 11.0 }
  0x4d   :  { %s160_s30 = sadd.f32 %s159_s25, %s156_s27  ;;  %s176_s3 = smul.f32 %s555_s21, %s162_s28 }
  0x4e   :  { %164 = sst [smem:[#allocation7 + $0x280]] %s158_s29  ;;  %p458_p6 = scmp.le.f32.partialorder %s672_s22, 12.0 }
  0x4f   :  { %166 = sst [smem:[#allocation7 + $0x281]] %s160_s30  ;;  %s177_s4 = smul.f32 %s553_s20, %s160_s30 }
  0x50   :  { %168 = sst [smem:[#allocation7 + $0x282]] %s162_s28  ;;  %p461_p9 = scmp.le.f32.partialorder %s672_s22, 13.0 }
  0x51   :  { %s442_s5 = scalar_select %p173_p4, %s551_s19, 0.0 }
  0x52   :  { %s180_s6 = sadd.f32 %s176_s3, %s158_s29  ;;  %p456_p4 = scmp.ge.f32.partialorder %s562_s23, 11.0 }
  0x53   :  { %s178_s7 = smul.f32 %s442_s5, %s158_s29  ;;  %s182_s8 = ssub.f32 %s160_s30, %s177_s4 }
  0x54   :  { %s184_s9 = ssub.f32 %s162_s28, %s176_s3  ;;  %p288_p5 = pnand %p456_p4, %p455_p3 }
  0x55   :  { %s179_s10 = smul.f32 %s178_s7, %s160_s30  ;;  %193 = sst [smem:[#allocation7 + $0x303]] %s549_s1 }
  0x56   :  { %s185_s11 = sadd.f32 %s184_s9, %s177_s4  ;;  %p464_p12 = scmp.le.f32.partialorder %s672_s22, 14.0 }
  0x57   :  { %s181_s12 = ssub.f32 %s180_s6, %s179_s10  ;;  %p467_p1 = scmp.le.f32.partialorder %s672_s22, 15.0 }
  0x58   :  { %s183_s13 = sadd.f32 %s182_s8, %s179_s10  ;;  %s199_s14 = smul.f32 %s555_s21, %s185_s11 }
  0x59   :  { %187 = sst [smem:[#allocation7 + $0x300]] %s181_s12 }
  0x5a   :  { %189 = sst [smem:[#allocation7 + $0x301]] %s183_s13  ;;  %s200_s15 = smul.f32 %s553_s20, %s183_s13 }
  0x5b   :  { %191 = sst [smem:[#allocation7 + $0x302]] %s185_s11 }
  0x5c   :  { %s445_s16 = scalar_select %p196_p7, %s551_s19, 0.0 }
  0x5d   :  { %s203_s17 = sadd.f32 %s199_s14, %s181_s12  ;;  %p459_p7 = scmp.ge.f32.partialorder %s562_s23, 12.0 }
  0x5e   :  { %s201_s18 = smul.f32 %s445_s16, %s181_s12  ;;  %s205_s0 = ssub.f32 %s183_s13, %s200_s15 }
  0x5f   :  { %s207_s24 = ssub.f32 %s185_s11, %s199_s14  ;;  %p311_p8 = pnand %p459_p7, %p458_p6 }
  0x60   :  { %s202_s25 = smul.f32 %s201_s18, %s183_s13  ;;  %216 = sst [smem:[#allocation7 + $0x383]] %s549_s1 }
  0x61   :  { %s208_s26 = sadd.f32 %s207_s24, %s200_s15 }
  0x62   :  { %s204_s27 = ssub.f32 %s203_s17, %s202_s25 }
  0x63   :  { %s206_s28 = sadd.f32 %s205_s0, %s202_s25  ;;  %s222_s29 = smul.f32 %s555_s21, %s208_s26 }
  0x64   :  { %210 = sst [smem:[#allocation7 + $0x380]] %s204_s27 }
  0x65   :  { %212 = sst [smem:[#allocation7 + $0x381]] %s206_s28  ;;  %s223_s30 = smul.f32 %s553_s20, %s206_s28 }
  0x66   :  { %214 = sst [smem:[#allocation7 + $0x382]] %s208_s26 }
  0x67   :  { %s448_s3 = scalar_select %p219_p10, %s551_s19, 0.0 }
  0x68   :  { %s226_s4 = sadd.f32 %s222_s29, %s204_s27  ;;  %p462_p10 = scmp.ge.f32.partialorder %s562_s23, 13.0 }
  0x69   :  { %s224_s5 = smul.f32 %s448_s3, %s204_s27  ;;  %s228_s6 = ssub.f32 %s206_s28, %s223_s30 }
  0x6a   :  { %s230_s7 = ssub.f32 %s208_s26, %s222_s29  ;;  %p334_p11 = pnand %p462_p10, %p461_p9 }
  0x6b   :  { %s225_s8 = smul.f32 %s224_s5, %s206_s28  ;;  %239 = sst [smem:[#allocation7 + $0x403]] %s549_s1 }
  0x6c   :  { %s231_s9 = sadd.f32 %s230_s7, %s223_s30 }
  0x6d   :  { %s227_s10 = ssub.f32 %s226_s4, %s225_s8 }
  0x6e   :  { %s229_s11 = sadd.f32 %s228_s6, %s225_s8  ;;  %s245_s12 = smul.f32 %s555_s21, %s231_s9 }
  0x6f   :  { %233 = sst [smem:[#allocation7 + $0x400]] %s227_s10 }
  0x70   :  { %235 = sst [smem:[#allocation7 + $0x401]] %s229_s11  ;;  %s246_s13 = smul.f32 %s553_s20, %s229_s11 }
  0x71   :  { %237 = sst [smem:[#allocation7 + $0x402]] %s231_s9 }
  0x72   :  { %s451_s14 = scalar_select %p242_p13, %s551_s19, 0.0 }
  0x73   :  { %s249_s15 = sadd.f32 %s245_s12, %s227_s10  ;;  %p465_p13 = scmp.ge.f32.partialorder %s562_s23, 14.0 }
  0x74   :  { %s247_s16 = smul.f32 %s451_s14, %s227_s10  ;;  %s251_s17 = ssub.f32 %s229_s11, %s246_s13 }
  0x75   :  { %s253_s18 = ssub.f32 %s231_s9, %s245_s12  ;;  %p357_p0 = pnand %p465_p13, %p464_p12 }
  0x76   :  { %s248_s0 = smul.f32 %s247_s16, %s229_s11  ;;  %262 = sst [smem:[#allocation7 + $0x483]] %s549_s1 }
  0x77   :  { %s254_s24 = sadd.f32 %s253_s18, %s246_s13 }
  0x78   :  { %s250_s25 = ssub.f32 %s249_s15, %s248_s0 }
  0x79   :  { %s252_s26 = sadd.f32 %s251_s17, %s248_s0  ;;  %s268_s27 = smul.f32 %s555_s21, %s254_s24 }
  0x7a   :  { %256 = sst [smem:[#allocation7 + $0x480]] %s250_s25 }
  0x7b   :  { %258 = sst [smem:[#allocation7 + $0x481]] %s252_s26  ;;  %s269_s28 = smul.f32 %s553_s20, %s252_s26 }
  0x7c   :  { %260 = sst [smem:[#allocation7 + $0x482]] %s254_s24 }
  0x7d   :  { %s454_s29 = scalar_select %p265_p2, %s551_s19, 0.0 }
  0x7e   :  { %s272_s30 = sadd.f32 %s268_s27, %s250_s25  ;;  %p468_p2 = scmp.ge.f32.partialorder %s562_s23, 15.0 }
  0x7f   :  { %s270_s3 = smul.f32 %s454_s29, %s250_s25  ;;  %s274_s4 = ssub.f32 %s252_s26, %s269_s28 }
  0x80   :  { %s276_s5 = ssub.f32 %s254_s24, %s268_s27  ;;  %p380_p3 = pnand %p468_p2, %p467_p1 }
  0x81   :  { %s271_s6 = smul.f32 %s270_s3, %s252_s26  ;;  %285 = sst [smem:[#allocation7 + $0x503]] %s549_s1 }
  0x82   :  { %s277_s7 = sadd.f32 %s276_s5, %s269_s28 }
  0x83   :  { %s273_s8 = ssub.f32 %s272_s30, %s271_s6 }
  0x84   :  { %s275_s9 = sadd.f32 %s274_s4, %s271_s6  ;;  %s291_s10 = smul.f32 %s555_s21, %s277_s7 }
  0x85   :  { %279 = sst [smem:[#allocation7 + $0x500]] %s273_s8 }
  0x86   :  { %281 = sst [smem:[#allocation7 + $0x501]] %s275_s9  ;;  %s292_s11 = smul.f32 %s553_s20, %s275_s9 }
  0x87   :  { %283 = sst [smem:[#allocation7 + $0x502]] %s277_s7 }
  0x88   :  { %s457_s12 = scalar_select %p288_p5, %s551_s19, 0.0 }
  0x89   :  { %s295_s13 = sadd.f32 %s291_s10, %s273_s8 }
  0x8a   :  { %s293_s14 = smul.f32 %s457_s12, %s273_s8  ;;  %s297_s15 = ssub.f32 %s275_s9, %s292_s11 }
  0x8b   :  { %s299_s16 = ssub.f32 %s277_s7, %s291_s10 }
  0x8c   :  { %s294_s17 = smul.f32 %s293_s14, %s275_s9  ;;  %308 = sst [smem:[#allocation7 + $0x583]] %s549_s1 }
  0x8d   :  { %s300_s18 = sadd.f32 %s299_s16, %s292_s11 }
  0x8e   :  { %s296_s0 = ssub.f32 %s295_s13, %s294_s17 }
  0x8f   :  { %s298_s24 = sadd.f32 %s297_s15, %s294_s17  ;;  %s314_s25 = smul.f32 %s555_s21, %s300_s18 }
  0x90   :  { %302 = sst [smem:[#allocation7 + $0x580]] %s296_s0 }
  0x91   :  { %304 = sst [smem:[#allocation7 + $0x581]] %s298_s24  ;;  %s315_s26 = smul.f32 %s553_s20, %s298_s24 }
  0x92   :  { %306 = sst [smem:[#allocation7 + $0x582]] %s300_s18 }
  0x93   :  { %s460_s27 = scalar_select %p311_p8, %s551_s19, 0.0 }
  0x94   :  { %s318_s28 = sadd.f32 %s314_s25, %s296_s0 }
  0x95   :  { %s316_s29 = smul.f32 %s460_s27, %s296_s0  ;;  %s320_s30 = ssub.f32 %s298_s24, %s315_s26 }
  0x96   :  { %s322_s3 = ssub.f32 %s300_s18, %s314_s25 }
  0x97   :  { %s317_s4 = smul.f32 %s316_s29, %s298_s24  ;;  %331 = sst [smem:[#allocation7 + $0x603]] %s549_s1 }
  0x98   :  { %s323_s5 = sadd.f32 %s322_s3, %s315_s26 }
  0x99   :  { %s319_s6 = ssub.f32 %s318_s28, %s317_s4 }
  0x9a   :  { %s321_s7 = sadd.f32 %s320_s30, %s317_s4  ;;  %s337_s8 = smul.f32 %s555_s21, %s323_s5 }
  0x9b   :  { %325 = sst [smem:[#allocation7 + $0x600]] %s319_s6 }
  0x9c   :  { %327 = sst [smem:[#allocation7 + $0x601]] %s321_s7  ;;  %s338_s9 = smul.f32 %s553_s20, %s321_s7 }
  0x9d   :  { %329 = sst [smem:[#allocation7 + $0x602]] %s323_s5 }
  0x9e   :  { %s463_s10 = scalar_select %p334_p11, %s551_s19, 0.0 }
  0x9f   :  { %s341_s11 = sadd.f32 %s337_s8, %s319_s6 }
  0xa0   :  { %s339_s12 = smul.f32 %s463_s10, %s319_s6  ;;  %s343_s13 = ssub.f32 %s321_s7, %s338_s9 }
  0xa1   :  { %s345_s14 = ssub.f32 %s323_s5, %s337_s8  ;;  %s405_s10 = sshll.u32 %s670_s2, 4  ;;  %s406_s10 = int_to_ptr.vmem [resolvable:$true] %s405_s10 }
  0xa2   :  { %s340_s15 = smul.f32 %s339_s12, %s321_s7  ;;  %354 = sst [smem:[#allocation7 + $0x683]] %s549_s1 }
  0xa3   :  { %s346_s16 = sadd.f32 %s345_s14, %s338_s9 }
  0xa4   :  { %s342_s17 = ssub.f32 %s341_s11, %s340_s15 }
  0xa5   :  { %s344_s18 = sadd.f32 %s343_s13, %s340_s15  ;;  %s360_s0 = smul.f32 %s555_s21, %s346_s16 }
  0xa6   :  { %348 = sst [smem:[#allocation7 + $0x680]] %s342_s17 }
  0xa7   :  { %350 = sst [smem:[#allocation7 + $0x681]] %s344_s18  ;;  %s361_s24 = smul.f32 %s553_s20, %s344_s18 }
  0xa8   :  { %352 = sst [smem:[#allocation7 + $0x682]] %s346_s16 }
  0xa9   :  { %s466_s25 = scalar_select %p357_p0, %s551_s19, 0.0 }
  0xaa   :  { %s364_s26 = sadd.f32 %s360_s0, %s342_s17  ;;  %s674_s19 = smov (!%p380_p3, %s551_s19), 0.0 }
  0xab   :  { %s362_s27 = smul.f32 %s466_s25, %s342_s17  ;;  %s366_s28 = ssub.f32 %s344_s18, %s361_s24 }
  0xac   :  { %s368_s29 = ssub.f32 %s346_s16, %s360_s0  ;;  %s521_s17 = smov 8  }
  0xad   :  { %s363_s30 = smul.f32 %s362_s27, %s344_s18  ;;  %377 = sst [smem:[#allocation7 + $0x703]] %s549_s1 }
  0xae   :  { %s369_s3 = sadd.f32 %s368_s29, %s361_s24 }
  0xaf   :  { %s365_s4 = ssub.f32 %s364_s26, %s363_s30 }
  0xb0   :  { %s367_s5 = sadd.f32 %s366_s28, %s363_s30  ;;  %s383_s6 = smul.f32 %s555_s21, %s369_s3 }
  0xb1   :  { %371 = sst [smem:[#allocation7 + $0x700]] %s365_s4  ;;  %s385_s11 = smul.f32 %s674_s19, %s365_s4 }
  0xb2   :  { %373 = sst [smem:[#allocation7 + $0x701]] %s367_s5  ;;  %s384_s7 = smul.f32 %s553_s20, %s367_s5 }
  0xb3   :  { %375 = sst [smem:[#allocation7 + $0x702]] %s369_s3  ;;  %s386_s13 = smul.f32 %s385_s11, %s367_s5 }
  0xb4   :  { %s387_s8 = sadd.f32 %s383_s6, %s365_s4  ;;  %s519_s20 = smov [#allocation7]  }
  0xb5   :  { %s389_s23 = ssub.f32 %s367_s5, %s384_s7  ;;  %s520_s21 = smov 128  }
  0xb6   :  { %s391_s12 = ssub.f32 %s369_s3, %s383_s6 }
  0xb7   :  { %400 = sst [smem:[#allocation7 + $0x783]] %s549_s1 }
  0xb8   :  { %s392_s14 = sadd.f32 %s391_s12, %s384_s7 }
  0xb9   :  { %s388_s15 = ssub.f32 %s387_s8, %s386_s13 }
  0xba   :  { %s390_s16 = sadd.f32 %s389_s23, %s386_s13 }
  0xbb   :  { %394 = sst [smem:[#allocation7 + $0x780]] %s388_s15 }
  0xbc   :  { %396 = sst [smem:[#allocation7 + $0x781]] %s390_s16 }
  0xbd   :  { %398 = sst [smem:[#allocation7 + $0x782]] %s392_s14 }
  0xbe   :  { %411 = dma.smem_to_vmem %s519_s20, 256, %s406_s10, [#allocation4], %s520_s21, %s520_s21, %s521_s17  }
  0xbf   :  { %515 = dma.done.wait [#allocation4], 256  }
  0xc0   :  { %516 = vsyncadd [#allocation4], 4294967040 }
  0xc1   :  { %416 = sfence }
  0xc2   :  { %417 = vsyncpa [#allocation3], 1 }
  0xc3   :  { %418 = vsyncpa [#allocation6], 1 }
  0xc4   :  { %419 = vsyncpa [#allocation4], 1 }

</bundles_post_ra>
